<compile_context>
chip_gen: v5e
topology: v5e:2x2
jax: 0.10.0
libtpu: 0.0.40
codegen_flags: <defaults>
</compile_context>

<pallas_src>
import jax
import jax.numpy as jnp
from jax.experimental import pallas as pl
from jax.experimental.pallas import tpu as pltpu

# Flat parameter layout (float32):
#   [0:8)   w1 (2x4, row-major)    [8:12)  b1
#   [12:28) w2 (4x4, row-major)    [28:32) b2
#   [32:36) w3 (4x1)               [36]    b3
W1_OFF, B1_OFF, W2_OFF, B2_OFF, W3_OFF, B3_OFF = 0, 8, 12, 28, 32, 36
N_PARAMS = 37

LANE = 128        # lanes per vreg
MAX_TILE_R = 256  # rows-of-128 per grid step: 256*128 = 32K batch elems/tile
                  # (x tile 256 KiB + out tile 128 KiB, double-buffered < 1 MiB)


def mlp_kernel(w_ref, x_ref, o_ref):
    """w_ref: SMEM (37,) f32; x_ref: VMEM (2, tile_r, 128); o_ref: (tile_r, 128)."""
    x0 = x_ref[0]  # (tile_r, 128) — feature 0 for this batch tile
    x1 = x_ref[1]  # (tile_r, 128) — feature 1

    # Layer 1: 2 -> 4  (scalar-broadcast MACs on VPU, sigmoid on EUP)
    h1 = []
    for j in range(4):
        z = x0 * w_ref[W1_OFF + j] + x1 * w_ref[W1_OFF + 4 + j] + w_ref[B1_OFF + j]
        h1.append(jax.nn.sigmoid(z))

    # Layer 2: 4 -> 4
    h2 = []
    for j in range(4):
        z = h1[0] * w_ref[W2_OFF + j]
        for i in range(1, 4):
            z = z + h1[i] * w_ref[W2_OFF + 4 * i + j]
        h2.append(jax.nn.sigmoid(z + w_ref[B2_OFF + j]))

    # Layer 3: 4 -> 1
    z = h2[0] * w_ref[W3_OFF + 0]
    for i in range(1, 4):
        z = z + h2[i] * w_ref[W3_OFF + i]
    o_ref[...] = z + w_ref[B3_OFF]


def mlp_forward(x, w_flat, *, max_tile_r=MAX_TILE_R):
    """x: [batch, 2] float32, w_flat: [37] float32 -> [batch, 1] float32."""
    batch = x.shape[0]

    rows = max(1, -(-batch // LANE))               # rows of 128 batch elements
    tile_r = min(max_tile_r, ((rows + 7) // 8) * 8)  # multiple of 8 sublanes
    tile_r = max(tile_r, 8)
    R = -(-rows // tile_r) * tile_r                # rows padded to tile multiple
    batch_p = R * LANE

    # Batch goes to the lane dim: [batch,2] -> [2,batch_p] -> [2, R, 128].
    x_t = jnp.pad(x.T.astype(jnp.float32), ((0, 0), (0, batch_p - batch)))
    x3 = x_t.reshape(2, R, LANE)

    out = pl.pallas_call(
        mlp_kernel,
        out_shape=jax.ShapeDtypeStruct((R, LANE), jnp.float32),
        grid_spec=pltpu.PrefetchScalarGridSpec(
            num_scalar_prefetch=1,                 # w_flat -> SMEM
            grid=(R // tile_r,),
            in_specs=[
                pl.BlockSpec((2, tile_r, LANE), lambda i, w: (0, i, 0)),
            ],
            out_specs=pl.BlockSpec((tile_r, LANE), lambda i, w: (i, 0)),
        ),
        compiler_params=pltpu.CompilerParams(
            dimension_semantics=("parallel",),     # megacore sharding on v7x
        ),
    )(w_flat, x3)

    return out.reshape(-1)[:batch, None]


def pack_params(params):
    """Pack (w,b) pairs into the flat [37] f32 vector (done once, not per call)."""
    (w1, b1), (w2, b2), (w3, b3) = params
    flat = jnp.concatenate(
        [w1.reshape(-1), b1, w2.reshape(-1), b2, w3.reshape(-1), b3]
    ).astype(jnp.float32)
    assert flat.shape == (N_PARAMS,)
    return flat


def init_params(key):
    """Deterministic init mirroring PyTorch Linear default (uniform ±1/sqrt(fan_in))."""
    dims = [(2, 4), (4, 4), (4, 1)]
    params = []
    for (fan_in, fan_out) in dims:
        key, kw, kb = jax.random.split(key, 3)
        bound = 1.0 / jnp.sqrt(fan_in)
        w = jax.random.uniform(kw, (fan_in, fan_out), jnp.float32, -bound, bound)
        b = jax.random.uniform(kb, (fan_out,), jnp.float32, -bound, bound)
        params.append((w, b))
    return params


def mlp_reference(x, params):
    (w1, b1), (w2, b2), (w3, b3) = params
    h1 = jax.nn.sigmoid(x @ w1 + b1)
    h2 = jax.nn.sigmoid(h1 @ w2 + b2)
    return h2 @ w3 + b3


# TODO(synk): Model.train() (Adam + MSELoss backward step) is not part of
# forward() and is not implemented as a Pallas kernel.

if __name__ == "__main__":
    key = jax.random.PRNGKey(0)
    key, kx = jax.random.split(key)
    x = jax.random.normal(kx, (8, 2), jnp.float32)  # batch=8, in_features=2

    params = init_params(key)
    w_flat = pack_params(params)  # hoisted out of the per-call path

    out = mlp_forward(x, w_flat)
    out = jax.block_until_ready(out)

    ref = mlp_reference(x, params)
    assert out.shape == (8, 1)
    assert jnp.allclose(out, ref, atol=1e-5, rtol=1e-5), "mismatch vs reference"

    print("KERNEL_OK")
</pallas_src>

<mosaic_0001>
module attributes {stable_mosaic.version = 11 : i64} {
  func.func @mlp_kernel(%arg0: i32, %arg1: memref<37xf32, #tpu.memory_space<smem>>, %arg2: memref<2x8x128xf32, #tpu.memory_space<vmem>>, %arg3: memref<8x128xf32, #tpu.memory_space<vmem>>) attributes {dimension_semantics = [#tpu.dimension_semantics<parallel>], iteration_bounds = array<i64: 1>, scalar_prefetch = 1 : i64, scratch_operands = 0 : i64, tpu.core_type = #tpu.core_type<tc>, window_params = [{transform_indices = @transform_0, window_bounds = array<i64: 2, 8, 128>}, {transform_indices = @transform_1, window_bounds = array<i64: 8, 128>}]} {
    %c0 = arith.constant 0 : index
    %c0_0 = arith.constant 0 : index
    %c0_1 = arith.constant 0 : index
    %0 = vector.load %arg2[%c0, %c0_0, %c0_1] : memref<2x8x128xf32, #tpu.memory_space<vmem>>, vector<1x8x128xf32>
    %1 = vector.shape_cast %0 : vector<1x8x128xf32> to vector<8x128xf32>
    %c1 = arith.constant 1 : index
    %c0_2 = arith.constant 0 : index
    %c0_3 = arith.constant 0 : index
    %2 = vector.load %arg2[%c1, %c0_2, %c0_3] : memref<2x8x128xf32, #tpu.memory_space<vmem>>, vector<1x8x128xf32>
    %3 = vector.shape_cast %2 : vector<1x8x128xf32> to vector<8x128xf32>
    %c0_4 = arith.constant 0 : index
    %4 = memref.load %arg1[%c0_4] : memref<37xf32, #tpu.memory_space<smem>>
    %5 = vector.broadcast %4 : f32 to vector<8x128xf32>
    %6 = arith.mulf %1, %5 : vector<8x128xf32>
    %c4 = arith.constant 4 : index
    %7 = memref.load %arg1[%c4] : memref<37xf32, #tpu.memory_space<smem>>
    %8 = vector.broadcast %7 : f32 to vector<8x128xf32>
    %9 = arith.mulf %3, %8 : vector<8x128xf32>
    %10 = arith.addf %6, %9 : vector<8x128xf32>
    %c8 = arith.constant 8 : index
    %11 = memref.load %arg1[%c8] : memref<37xf32, #tpu.memory_space<smem>>
    %12 = vector.broadcast %11 : f32 to vector<8x128xf32>
    %13 = arith.addf %10, %12 : vector<8x128xf32>
    %14 = arith.negf %13 : vector<8x128xf32>
    %15 = math.exp %14 : vector<8x128xf32>
    %cst = arith.constant 1.000000e+00 : f32
    %16 = vector.broadcast %cst : f32 to vector<8x128xf32>
    %17 = arith.addf %16, %15 : vector<8x128xf32>
    %18 = arith.divf %16, %17 : vector<8x128xf32>
    %c1_5 = arith.constant 1 : index
    %19 = memref.load %arg1[%c1_5] : memref<37xf32, #tpu.memory_space<smem>>
    %20 = vector.broadcast %19 : f32 to vector<8x128xf32>
    %21 = arith.mulf %1, %20 : vector<8x128xf32>
    %c5 = arith.constant 5 : index
    %22 = memref.load %arg1[%c5] : memref<37xf32, #tpu.memory_space<smem>>
    %23 = vector.broadcast %22 : f32 to vector<8x128xf32>
    %24 = arith.mulf %3, %23 : vector<8x128xf32>
    %25 = arith.addf %21, %24 : vector<8x128xf32>
    %c9 = arith.constant 9 : index
    %26 = memref.load %arg1[%c9] : memref<37xf32, #tpu.memory_space<smem>>
    %27 = vector.broadcast %26 : f32 to vector<8x128xf32>
    %28 = arith.addf %25, %27 : vector<8x128xf32>
    %29 = arith.negf %28 : vector<8x128xf32>
    %30 = math.exp %29 : vector<8x128xf32>
    %cst_6 = arith.constant 1.000000e+00 : f32
    %31 = vector.broadcast %cst_6 : f32 to vector<8x128xf32>
    %32 = arith.addf %31, %30 : vector<8x128xf32>
    %33 = arith.divf %31, %32 : vector<8x128xf32>
    %c2 = arith.constant 2 : index
    %34 = memref.load %arg1[%c2] : memref<37xf32, #tpu.memory_space<smem>>
    %35 = vector.broadcast %34 : f32 to vector<8x128xf32>
    %36 = arith.mulf %1, %35 : vector<8x128xf32>
    %c6 = arith.constant 6 : index
    %37 = memref.load %arg1[%c6] : memref<37xf32, #tpu.memory_space<smem>>
    %38 = vector.broadcast %37 : f32 to vector<8x128xf32>
    %39 = arith.mulf %3, %38 : vector<8x128xf32>
    %40 = arith.addf %36, %39 : vector<8x128xf32>
    %c10 = arith.constant 10 : index
    %41 = memref.load %arg1[%c10] : memref<37xf32, #tpu.memory_space<smem>>
    %42 = vector.broadcast %41 : f32 to vector<8x128xf32>
    %43 = arith.addf %40, %42 : vector<8x128xf32>
    %44 = arith.negf %43 : vector<8x128xf32>
    %45 = math.exp %44 : vector<8x128xf32>
    %cst_7 = arith.constant 1.000000e+00 : f32
    %46 = vector.broadcast %cst_7 : f32 to vector<8x128xf32>
    %47 = arith.addf %46, %45 : vector<8x128xf32>
    %48 = arith.divf %46, %47 : vector<8x128xf32>
    %c3 = arith.constant 3 : index
    %49 = memref.load %arg1[%c3] : memref<37xf32, #tpu.memory_space<smem>>
    %50 = vector.broadcast %49 : f32 to vector<8x128xf32>
    %51 = arith.mulf %1, %50 : vector<8x128xf32>
    %c7 = arith.constant 7 : index
    %52 = memref.load %arg1[%c7] : memref<37xf32, #tpu.memory_space<smem>>
    %53 = vector.broadcast %52 : f32 to vector<8x128xf32>
    %54 = arith.mulf %3, %53 : vector<8x128xf32>
    %55 = arith.addf %51, %54 : vector<8x128xf32>
    %c11 = arith.constant 11 : index
    %56 = memref.load %arg1[%c11] : memref<37xf32, #tpu.memory_space<smem>>
    %57 = vector.broadcast %56 : f32 to vector<8x128xf32>
    %58 = arith.addf %55, %57 : vector<8x128xf32>
    %59 = arith.negf %58 : vector<8x128xf32>
    %60 = math.exp %59 : vector<8x128xf32>
    %cst_8 = arith.constant 1.000000e+00 : f32
    %61 = vector.broadcast %cst_8 : f32 to vector<8x128xf32>
    %62 = arith.addf %61, %60 : vector<8x128xf32>
    %63 = arith.divf %61, %62 : vector<8x128xf32>
    %c12 = arith.constant 12 : index
    %64 = memref.load %arg1[%c12] : memref<37xf32, #tpu.memory_space<smem>>
    %65 = vector.broadcast %64 : f32 to vector<8x128xf32>
    %66 = arith.mulf %18, %65 : vector<8x128xf32>
    %c16 = arith.constant 16 : index
    %67 = memref.load %arg1[%c16] : memref<37xf32, #tpu.memory_space<smem>>
    %68 = vector.broadcast %67 : f32 to vector<8x128xf32>
    %69 = arith.mulf %33, %68 : vector<8x128xf32>
    %70 = arith.addf %66, %69 : vector<8x128xf32>
    %c20 = arith.constant 20 : index
    %71 = memref.load %arg1[%c20] : memref<37xf32, #tpu.memory_space<smem>>
    %72 = vector.broadcast %71 : f32 to vector<8x128xf32>
    %73 = arith.mulf %48, %72 : vector<8x128xf32>
    %74 = arith.addf %70, %73 : vector<8x128xf32>
    %c24 = arith.constant 24 : index
    %75 = memref.load %arg1[%c24] : memref<37xf32, #tpu.memory_space<smem>>
    %76 = vector.broadcast %75 : f32 to vector<8x128xf32>
    %77 = arith.mulf %63, %76 : vector<8x128xf32>
    %78 = arith.addf %74, %77 : vector<8x128xf32>
    %c28 = arith.constant 28 : index
    %79 = memref.load %arg1[%c28] : memref<37xf32, #tpu.memory_space<smem>>
    %80 = vector.broadcast %79 : f32 to vector<8x128xf32>
    %81 = arith.addf %78, %80 : vector<8x128xf32>
    %82 = arith.negf %81 : vector<8x128xf32>
    %83 = math.exp %82 : vector<8x128xf32>
    %cst_9 = arith.constant 1.000000e+00 : f32
    %84 = vector.broadcast %cst_9 : f32 to vector<8x128xf32>
    %85 = arith.addf %84, %83 : vector<8x128xf32>
    %86 = arith.divf %84, %85 : vector<8x128xf32>
    %c13 = arith.constant 13 : index
    %87 = memref.load %arg1[%c13] : memref<37xf32, #tpu.memory_space<smem>>
    %88 = vector.broadcast %87 : f32 to vector<8x128xf32>
    %89 = arith.mulf %18, %88 : vector<8x128xf32>
    %c17 = arith.constant 17 : index
    %90 = memref.load %arg1[%c17] : memref<37xf32, #tpu.memory_space<smem>>
    %91 = vector.broadcast %90 : f32 to vector<8x128xf32>
    %92 = arith.mulf %33, %91 : vector<8x128xf32>
    %93 = arith.addf %89, %92 : vector<8x128xf32>
    %c21 = arith.constant 21 : index
    %94 = memref.load %arg1[%c21] : memref<37xf32, #tpu.memory_space<smem>>
    %95 = vector.broadcast %94 : f32 to vector<8x128xf32>
    %96 = arith.mulf %48, %95 : vector<8x128xf32>
    %97 = arith.addf %93, %96 : vector<8x128xf32>
    %c25 = arith.constant 25 : index
    %98 = memref.load %arg1[%c25] : memref<37xf32, #tpu.memory_space<smem>>
    %99 = vector.broadcast %98 : f32 to vector<8x128xf32>
    %100 = arith.mulf %63, %99 : vector<8x128xf32>
    %101 = arith.addf %97, %100 : vector<8x128xf32>
    %c29 = arith.constant 29 : index
    %102 = memref.load %arg1[%c29] : memref<37xf32, #tpu.memory_space<smem>>
    %103 = vector.broadcast %102 : f32 to vector<8x128xf32>
    %104 = arith.addf %101, %103 : vector<8x128xf32>
    %105 = arith.negf %104 : vector<8x128xf32>
    %106 = math.exp %105 : vector<8x128xf32>
    %cst_10 = arith.constant 1.000000e+00 : f32
    %107 = vector.broadcast %cst_10 : f32 to vector<8x128xf32>
    %108 = arith.addf %107, %106 : vector<8x128xf32>
    %109 = arith.divf %107, %108 : vector<8x128xf32>
    %c14 = arith.constant 14 : index
    %110 = memref.load %arg1[%c14] : memref<37xf32, #tpu.memory_space<smem>>
    %111 = vector.broadcast %110 : f32 to vector<8x128xf32>
    %112 = arith.mulf %18, %111 : vector<8x128xf32>
    %c18 = arith.constant 18 : index
    %113 = memref.load %arg1[%c18] : memref<37xf32, #tpu.memory_space<smem>>
    %114 = vector.broadcast %113 : f32 to vector<8x128xf32>
    %115 = arith.mulf %33, %114 : vector<8x128xf32>
    %116 = arith.addf %112, %115 : vector<8x128xf32>
    %c22 = arith.constant 22 : index
    %117 = memref.load %arg1[%c22] : memref<37xf32, #tpu.memory_space<smem>>
    %118 = vector.broadcast %117 : f32 to vector<8x128xf32>
    %119 = arith.mulf %48, %118 : vector<8x128xf32>
    %120 = arith.addf %116, %119 : vector<8x128xf32>
    %c26 = arith.constant 26 : index
    %121 = memref.load %arg1[%c26] : memref<37xf32, #tpu.memory_space<smem>>
    %122 = vector.broadcast %121 : f32 to vector<8x128xf32>
    %123 = arith.mulf %63, %122 : vector<8x128xf32>
    %124 = arith.addf %120, %123 : vector<8x128xf32>
    %c30 = arith.constant 30 : index
    %125 = memref.load %arg1[%c30] : memref<37xf32, #tpu.memory_space<smem>>
    %126 = vector.broadcast %125 : f32 to vector<8x128xf32>
    %127 = arith.addf %124, %126 : vector<8x128xf32>
    %128 = arith.negf %127 : vector<8x128xf32>
    %129 = math.exp %128 : vector<8x128xf32>
    %cst_11 = arith.constant 1.000000e+00 : f32
    %130 = vector.broadcast %cst_11 : f32 to vector<8x128xf32>
    %131 = arith.addf %130, %129 : vector<8x128xf32>
    %132 = arith.divf %130, %131 : vector<8x128xf32>
    %c15 = arith.constant 15 : index
    %133 = memref.load %arg1[%c15] : memref<37xf32, #tpu.memory_space<smem>>
    %134 = vector.broadcast %133 : f32 to vector<8x128xf32>
    %135 = arith.mulf %18, %134 : vector<8x128xf32>
    %c19 = arith.constant 19 : index
    %136 = memref.load %arg1[%c19] : memref<37xf32, #tpu.memory_space<smem>>
    %137 = vector.broadcast %136 : f32 to vector<8x128xf32>
    %138 = arith.mulf %33, %137 : vector<8x128xf32>
    %139 = arith.addf %135, %138 : vector<8x128xf32>
    %c23 = arith.constant 23 : index
    %140 = memref.load %arg1[%c23] : memref<37xf32, #tpu.memory_space<smem>>
    %141 = vector.broadcast %140 : f32 to vector<8x128xf32>
    %142 = arith.mulf %48, %141 : vector<8x128xf32>
    %143 = arith.addf %139, %142 : vector<8x128xf32>
    %c27 = arith.constant 27 : index
    %144 = memref.load %arg1[%c27] : memref<37xf32, #tpu.memory_space<smem>>
    %145 = vector.broadcast %144 : f32 to vector<8x128xf32>
    %146 = arith.mulf %63, %145 : vector<8x128xf32>
    %147 = arith.addf %143, %146 : vector<8x128xf32>
    %c31 = arith.constant 31 : index
    %148 = memref.load %arg1[%c31] : memref<37xf32, #tpu.memory_space<smem>>
    %149 = vector.broadcast %148 : f32 to vector<8x128xf32>
    %150 = arith.addf %147, %149 : vector<8x128xf32>
    %151 = arith.negf %150 : vector<8x128xf32>
    %152 = math.exp %151 : vector<8x128xf32>
    %cst_12 = arith.constant 1.000000e+00 : f32
    %153 = vector.broadcast %cst_12 : f32 to vector<8x128xf32>
    %154 = arith.addf %153, %152 : vector<8x128xf32>
    %155 = arith.divf %153, %154 : vector<8x128xf32>
    %c32 = arith.constant 32 : index
    %156 = memref.load %arg1[%c32] : memref<37xf32, #tpu.memory_space<smem>>
    %157 = vector.broadcast %156 : f32 to vector<8x128xf32>
    %158 = arith.mulf %86, %157 : vector<8x128xf32>
    %c33 = arith.constant 33 : index
    %159 = memref.load %arg1[%c33] : memref<37xf32, #tpu.memory_space<smem>>
    %160 = vector.broadcast %159 : f32 to vector<8x128xf32>
    %161 = arith.mulf %109, %160 : vector<8x128xf32>
    %162 = arith.addf %158, %161 : vector<8x128xf32>
    %c34 = arith.constant 34 : index
    %163 = memref.load %arg1[%c34] : memref<37xf32, #tpu.memory_space<smem>>
    %164 = vector.broadcast %163 : f32 to vector<8x128xf32>
    %165 = arith.mulf %132, %164 : vector<8x128xf32>
    %166 = arith.addf %162, %165 : vector<8x128xf32>
    %c35 = arith.constant 35 : index
    %167 = memref.load %arg1[%c35] : memref<37xf32, #tpu.memory_space<smem>>
    %168 = vector.broadcast %167 : f32 to vector<8x128xf32>
    %169 = arith.mulf %155, %168 : vector<8x128xf32>
    %170 = arith.addf %166, %169 : vector<8x128xf32>
    %c36 = arith.constant 36 : index
    %171 = memref.load %arg1[%c36] : memref<37xf32, #tpu.memory_space<smem>>
    %172 = vector.broadcast %171 : f32 to vector<8x128xf32>
    %173 = arith.addf %170, %172 : vector<8x128xf32>
    %c0_13 = arith.constant 0 : index
    %c0_14 = arith.constant 0 : index
    %174 = vector.load %arg3[%c0_13, %c0_14] : memref<8x128xf32, #tpu.memory_space<vmem>>, vector<8x128xf32>
    tpu.vector_store %arg3[%c0_13, %c0_14], %173 {strides = array<i32>} : memref<8x128xf32, #tpu.memory_space<vmem>>, vector<8x128xf32>,
    return
  }
  func.func @transform_0(%arg0: i32, %arg1: memref<37xf32, #tpu.memory_space<smem>>) -> (i32, i32, i32) {
    %c0_i32 = arith.constant 0 : i32
    %c0_i32_0 = arith.constant 0 : i32
    %c0_i32_1 = arith.constant 0 : i32
    return %c0_i32, %arg0, %c0_i32_0 : i32, i32, i32
  }
  func.func @transform_1(%arg0: i32, %arg1: memref<37xf32, #tpu.memory_space<smem>>) -> (i32, i32) {
    %c0_i32 = arith.constant 0 : i32
    %c0_i32_0 = arith.constant 0 : i32
    return %arg0, %c0_i32 : i32, i32
  }
}

</mosaic_0001>

<bundles_post_ra>
// kernel: tpu_custom_call.1
= control target key start
LH: loop header
LB: loop body
LE: loop exit
PB: predicated region body
PF: predicated region fallthrough
CT: control target
= control target key end

     0   :  { %s484_s12 = smov [#allocation3]   ;;  %s711_s0 = inlined_call_operand.hbm [shape: f32[37], index: 0, kind: input, shape index: {}]   ;;  %s712_s1 = inlined_call_operand.hbm [shape: f32[2,8,128], index: 1, kind: input, shape index: {}]   ;;  %s713_s2 = inlined_call_operand.hbm [shape: f32[8,128], index: 2, kind: output, shape index: {}]  }
   0x1   :  { %s8_s11 = sshll.u32 %s711_s0, 4  ;;  %s9_s11 = int_to_ptr.hbm [resolvable:$true] %s8_s11 }
   0x2   :  { %11 = dma.hbm_to_smem %s9_s11, 16, %s484_s12, [#allocation2] }
   0x3   :  { %478 = dma.done.wait [#allocation2], 16 }
   0x4   :  { %479 = vsyncadd [#allocation2], 4294967280 }
   0x5   :  { %14 = sfence }
   0x6   :  { %15 = vsyncpa [#allocation5], 0 }
   0x7   :  { %16 = vsyncpa [#allocation6], 0  ;;  %s21_s15 = sshll.u32 %s712_s1, 4  ;;  %s485_s16 = smov [#allocation4]   ;;  %s22_s15 = int_to_ptr.hbm [resolvable:$true] %s21_s15 }
   0x8   :  { %s23_s17 = sshll.u32 %s485_s16, 4  ;;  %s486_s18 = smov 128   ;;  %s24_s17 = int_to_ptr.vmem [resolvable:$true] %s23_s17 }
   0x9   :  { %s487_s19 = smov 8  }
   0xa   :  { %29 = dma.hbm_to_vmem [thread:$0]  %s22_s15, 256, %s24_s17, [#allocation5], %s486_s18, %s486_s18, %s487_s19  }
   0xb   :  { %480 = dma.done.wait [#allocation5], 256  }
   0xc   :  { %481 = vsyncadd [#allocation5], 4294967040  ;;  %s37_s0 = sld [smem:[#allocation3]]  ;;  %v34_v0 = vld [vmem:[#allocation4] sm:$0xff]  ;;  %v36_v1 = vld [vmem:[#allocation4 + $0x8] sm:$0xff] }
   0xd   :  { %s337_s20 = sld [smem:[#allocation3 + $0x4]] }
   0xe   :  { %s338_s21 = sld [smem:[#allocation3 + $0x8]] }
   0xf   :  { %s340_s22 = sld [smem:[#allocation3 + $0x1]] }
  0x10   :  { %s341_s23 = sld [smem:[#allocation3 + $0x5]] }
  0x11   :  { %s342_s24 = sld [smem:[#allocation3 + $0x9]] }
  0x12   :  { %v38_v2 = vstv %s37_s0  ;;  %s344_s25 = sld [smem:[#allocation3 + $0x2]] }
  0x13   :  { %v39_v3 = vmul.f32 %v38_v2, %v34_v0  ;;  %v41_v4 = vstv %s337_s20  ;;  %s345_s1 = sld [smem:[#allocation3 + $0x6]] }
  0x14   :  { %v42_v5 = vmul.f32 %v41_v4, %v36_v1  ;;  %s346_s26 = sld [smem:[#allocation3 + $0xa]]  ;;  %v45_v6 = vstv %s338_s21 }
  0x15   :  { %v67_v7 = vstv %s340_s22  ;;  %s348_s27 = sld [smem:[#allocation3 + $0x3]] }
  0x16   :  { %v43_v8 = vadd.f32 %v42_v5, %v39_v3  ;;  %v68_v9 = vmul.f32 %v67_v7, %v34_v0  ;;  %v70_v10 = vstv %s341_s23  ;;  %s349_s28 = sld [smem:[#allocation3 + $0x7]] }
  0x17   :  { %v71_v11 = vmul.f32 %v70_v10, %v36_v1  ;;  %s350_s29 = sld [smem:[#allocation3 + $0xb]]  ;;  %v74_v13 = vstv %s342_s24 }
  0x18   :  { %v46_v12 = vadd.f32 %v45_v6, %v43_v8  ;;  %v96_v14 = vstv %s344_s25  ;;  %s510_s30 = sld [smem:[#allocation3 + $0xc]] }
  0x19   :  { %v72_v15 = vadd.f32 %v71_v11, %v68_v9  ;;  %v97_v16 = vmul.f32 %v96_v14, %v34_v0  ;;  %v99_v17 = vstv %s345_s1  ;;  %s512_s3 = sld [smem:[#allocation3 + $0x10]]  ;;  %s488_s1 = smov [#allocation7]  }
  0x1a   :  { %v339_v18 = vmul.f32 -1.442695, %v46_v12  ;;  %v100_v19 = vmul.f32 %v99_v17, %v36_v1  ;;  %v103_v21 = vstv %s346_s26  ;;  %s514_s4 = sld [smem:[#allocation3 + $0x14]]  ;;  %s325_s26 = sshll.u32 %s488_s1, 4  ;;  %s326_s26 = int_to_ptr.vmem [resolvable:$true] %s325_s26 }
  0x1b   :  { %v75_v20 = vadd.f32 %v74_v13, %v72_v15  ;;  %v125_v22 = vstv %s348_s27  ;;  %s516_s5 = sld [smem:[#allocation3 + $0x18]] }
  0x1c   :  { %386 = vpow2.f32 %v339_v18  ;;  %v101_v23 = vadd.f32 %v100_v19, %v97_v16  ;;  %v126_v24 = vmul.f32 %v125_v22, %v34_v0  ;;  %v128_v25 = vstv %s349_s28  ;;  %s518_s6 = sld [smem:[#allocation3 + $0xd]] }
  0x1d   :  { %v343_v26 = vmul.f32 -1.442695, %v75_v20  ;;  %v129_v27 = vmul.f32 %v128_v25, %v36_v1  ;;  %v132_v29 = vstv %s350_s29  ;;  %s520_s7 = sld [smem:[#allocation3 + $0x11]]  ;;  %s327_s29 = sshll.u32 %s713_s2, 4  ;;  %s328_s29 = int_to_ptr.hbm [resolvable:$true] %s327_s29 }
  0x1e   :  { %v104_v28 = vadd.f32 %v103_v21, %v101_v23  ;;  %s522_s8 = sld [smem:[#allocation3 + $0x15]]  ;;  %v154_v42 = vstv %s510_s30 }
  0x1f   :  { %388 = vpow2.f32 %v343_v26  ;;  %v130_v30 = vadd.f32 %v129_v27, %v126_v24  ;;  %s524_s9 = sld [smem:[#allocation3 + $0x19]]  ;;  %v157_v43 = vstv %s512_s3 }
  0x20   :  { %v347_v31 = vmul.f32 -1.442695, %v104_v28  ;;  %s526_s10 = sld [smem:[#allocation3 + $0xe]]  ;;  %v161_v44 = vstv %s514_s4 }
  0x21   :  { %v133_v32 = vadd.f32 %v132_v29, %v130_v30  ;;  %s528_s11 = sld [smem:[#allocation3 + $0x12]]  ;;  %v165_v46 = vstv %s516_s5 }
  0x22   :  { %v387_v33 = vpop.eup %386  ;;  %390 = vpow2.f32 %v347_v31  ;;  %s532_s12 = sld [smem:[#allocation3 + $0x16]]  ;;  %v191_v47 = vstv %s518_s6 }
  0x23   :  { %v50_v34 = vadd.f32 1.0, %v387_v33  ;;  %v351_v35 = vmul.f32 -1.442695, %v133_v32  ;;  %s537_s13 = sld [smem:[#allocation3 + $0xf]]  ;;  %v194_v48 = vstv %s520_s7 }
  0x24   :  { %s543_s14 = sld [smem:[#allocation3 + $0x13]]  ;;  %v198_v52 = vstv %s522_s8 }
  0x25   :  { %v389_v36 = vpop.eup %388  ;;  %392 = vrcp.f32 %v50_v34  ;;  %v60_v39 = vand.u32 2147483647, %v50_v34  ;;  %v62_v41 = vand.u32 2147483648, %v50_v34  ;;  %vm56_vm0 = vweird.f32 %v50_v34  ;;  %s554_s15 = sld [smem:[#allocation3 + $0x17]] }
  0x26   :  { %v79_v37 = vadd.f32 1.0, %v389_v36  ;;  %394 = vpow2.f32 %v351_v35  ;;  %v202_v56 = vstv %s524_s9  ;;  %v228_v1 = vstv %s526_s10  ;;  %s586_s16 = sld [smem:[#allocation3 + $0x1a]] }
  0x27   :  { %vm546_vm1 = vcmp.eq.f32.partialorder %v60_v39, 8.507059e+37  ;;  %v63_v59 = vor.u32 1.1754944e-38, %v62_v41  ;;  %v231_v2 = vstv %s528_s11  ;;  %s592_s17 = sld [smem:[#allocation3 + $0x1b]] }
  0x28   :  { %v391_v38 = vpop.eup %390  ;;  %396 = vrcp.f32 %v79_v37  ;;  %v89_v51 = vand.u32 2147483647, %v79_v37  ;;  %v91_v54 = vand.u32 2147483648, %v79_v37  ;;  %vm85_vm3 = vweird.f32 %v79_v37  ;;  %s595_s18 = sld [smem:[#allocation3 + $0x1c]] }
  0x29   :  { %v530_v40 = vadd.f32 1.0, %v391_v38  ;;  %v235_v7 = vstv %s532_s12  ;;  %v265_v13 = vstv %s537_s13  ;;  %s609_s19 = sld [smem:[#allocation3 + $0x1d]] }
  0x2a   :  { %vm558_vm4 = vcmp.eq.f32.partialorder %v89_v51, 8.507059e+37  ;;  %v92_v6 = vor.u32 1.1754944e-38, %v91_v54  ;;  %v268_v14 = vstv %s543_s14  ;;  %s613_s0 = sld [smem:[#allocation3 + $0x1e]] }
  0x2b   :  { %v393_v45 = vpop.eup %392  ;;  %398 = vrcp.f32 %v530_v40  ;;  %v118_v60 = vand.u32 2147483647, %v530_v40  ;;  %v120_v62 = vand.u32 2147483648, %v530_v40  ;;  %vm114_vm7 = vweird.f32 %v530_v40  ;;  %s619_s20 = sld [smem:[#allocation3 + $0x1f]] }
  0x2c   :  { %v395_v49 = vpop.eup %394  ;;  %v52_v50 = vmul.f32 %v393_v45, %v50_v34  ;;  %vm57_vm2 = vweird.f32 %v393_v45  ;;  %v272_v25 = vstv %s554_s15  ;;  %s654_s21 = sld [smem:[#allocation3 + $0x20]] }
  0x2d   :  { %v550_v55 = vadd.f32 1.0, %v395_v49  ;;  %vm565_vm5 = vmor %vm56_vm0, %vm57_vm2  ;;  %vm572_vm8 = vcmp.eq.f32.partialorder %v118_v60, 8.507059e+37  ;;  %v121_v12 = vor.u32 1.1754944e-38, %v120_v62  ;;  %s656_s22 = sld [smem:[#allocation3 + $0x21]] }
  0x2e   :  { %v397_v57 = vpop.eup %396  ;;  %v53_v58 = vsub.f32 1.0, %v52_v50  ;;  %v169_v4 = vstv %s595_s18  ;;  %s667_s23 = sld [smem:[#allocation3 + $0x22]] }
  0x2f   :  { %v81_v61 = vmul.f32 %v397_v57, %v79_v37  ;;  %400 = vrcp.f32 %v550_v55  ;;  %vm86_vm6 = vweird.f32 %v397_v57  ;;  %vm143_vm11 = vweird.f32 %v550_v55  ;;  %s669_s24 = sld [smem:[#allocation3 + $0x23]] }
  0x30   :  { %v54_v63 = vmul.f32 %v393_v45, %v53_v58  ;;  %vm581_vm9 = vmor %vm85_vm3, %vm86_vm6  ;;  %v147_v21 = vand.u32 2147483647, %v550_v55  ;;  %v149_v22 = vand.u32 2147483648, %v550_v55  ;;  %s380_s25 = sld [smem:[#allocation3 + $0x24]] }
  0x31   :  { %v399_v3 = vpop.eup %398  ;;  %v82_v5 = vsub.f32 1.0, %v81_v61 }
  0x32   :  { %v55_v8 = vadd.f32 %v393_v45, %v54_v63  ;;  %v110_v9 = vmul.f32 %v399_v3, %v530_v40  ;;  %vm115_vm10 = vweird.f32 %v399_v3  ;;  %vm623_vm14 = vcmp.eq.f32.partialorder %v147_v21, 8.507059e+37 }
  0x33   :  { %v83_v11 = vmul.f32 %v397_v57, %v82_v5  ;;  %vm603_vm13 = vmor %vm114_vm7, %vm115_vm10  ;;  %v206_v5 = vstv %s609_s19 }
  0x34   :  { %v59_v15 = vsel %vm565_vm5, %v393_v45, %v55_v8  ;;  %v111_v17 = vsub.f32 1.0, %v110_v9 }
  0x35   :  { %v401_v18 = vpop.eup %400  ;;  %v64_v19 = vsel %vm546_vm1, %v63_v59, %v59_v15  ;;  %v84_v20 = vadd.f32 %v397_v57, %v83_v11  ;;  %v276_v59 = vstv %s592_s17 }
  0x36   :  { %v112_v23 = vmul.f32 %v399_v3, %v111_v17  ;;  %v139_v24 = vmul.f32 %v401_v18, %v550_v55  ;;  %vm144_vm12 = vweird.f32 %v401_v18  ;;  %v155_v28 = vmul.f32 %v154_v42, %v64_v19 }
  0x37   :  { %v88_v26 = vsel %vm581_vm9, %v397_v57, %v84_v20  ;;  %v192_v29 = vmul.f32 %v191_v47, %v64_v19  ;;  %v229_v30 = vmul.f32 %v228_v1, %v64_v19  ;;  %v266_v34 = vmul.f32 %v265_v13, %v64_v19  ;;  %vm632_vm15 = vmor %vm143_vm11, %vm144_vm12 }
  0x38   :  { %v93_v31 = vsel %vm558_vm4, %v92_v6, %v88_v26  ;;  %v113_v32 = vadd.f32 %v399_v3, %v112_v23  ;;  %v140_v33 = vsub.f32 1.0, %v139_v24  ;;  %v150_v42 = vor.u32 1.1754944e-38, %v149_v22 }
  0x39   :  { %v158_v35 = vmul.f32 %v157_v43, %v93_v31  ;;  %v195_v36 = vmul.f32 %v194_v48, %v93_v31  ;;  %v232_v37 = vmul.f32 %v231_v2, %v93_v31  ;;  %v269_v38 = vmul.f32 %v268_v14, %v93_v31 }
  0x3a   :  { %v117_v39 = vsel %vm603_vm13, %v399_v3, %v113_v32  ;;  %v141_v40 = vmul.f32 %v401_v18, %v140_v33  ;;  %v239_v57 = vstv %s586_s16  ;;  %v243_v6 = vstv %s613_s0 }
  0x3b   :  { %v122_v43 = vsel %vm572_vm8, %v121_v12, %v117_v39  ;;  %v159_v47 = vadd.f32 %v158_v35, %v155_v28  ;;  %v196_v48 = vadd.f32 %v195_v36, %v192_v29  ;;  %v233_v49 = vadd.f32 %v232_v37, %v229_v30 }
  0x3c   :  { %v142_v50 = vadd.f32 %v401_v18, %v141_v40  ;;  %v162_v51 = vmul.f32 %v161_v44, %v122_v43  ;;  %v199_v53 = vmul.f32 %v198_v52, %v122_v43  ;;  %v236_v54 = vmul.f32 %v235_v7, %v122_v43 }
  0x3d   :  { %v270_v55 = vadd.f32 %v269_v38, %v266_v34  ;;  %v273_v58 = vmul.f32 %v272_v25, %v122_v43  ;;  %v280_v7 = vstv %s619_s20  ;;  %v302_v34 = vstv %s654_s21 }
  0x3e   :  { %v146_v60 = vsel %vm632_vm15, %v401_v18, %v142_v50  ;;  %v163_v61 = vadd.f32 %v162_v51, %v159_v47  ;;  %v200_v62 = vadd.f32 %v199_v53, %v196_v48  ;;  %v237_v63 = vadd.f32 %v236_v54, %v233_v49 }
  0x3f   :  { %v151_v44 = vsel %vm623_vm14, %v150_v42, %v146_v60  ;;  %v274_v0 = vadd.f32 %v273_v58, %v270_v55 }
  0x40   :  { %v166_v52 = vmul.f32 %v165_v46, %v151_v44  ;;  %v203_v1 = vmul.f32 %v202_v56, %v151_v44  ;;  %v240_v2 = vmul.f32 %v239_v57, %v151_v44  ;;  %v277_v3 = vmul.f32 %v276_v59, %v151_v44 }
  0x41   :  { %v305_v44 = vstv %s656_s22 }
  0x42   :  { %v167_v8 = vadd.f32 %v166_v52, %v163_v61  ;;  %v204_v9 = vadd.f32 %v203_v1, %v200_v62  ;;  %v241_v10 = vadd.f32 %v240_v2, %v237_v63  ;;  %v278_v11 = vadd.f32 %v277_v3, %v274_v0 }
  0x44   :  { %v170_v12 = vadd.f32 %v169_v4, %v167_v8  ;;  %v207_v13 = vadd.f32 %v206_v5, %v204_v9  ;;  %v244_v14 = vadd.f32 %v243_v6, %v241_v10  ;;  %v281_v15 = vadd.f32 %v280_v7, %v278_v11 }
  0x45   :  { %v309_v10 = vstv %s667_s23 }
  0x46   :  { %v357_v16 = vmul.f32 -1.442695, %v170_v12  ;;  %v363_v17 = vmul.f32 -1.442695, %v207_v13  ;;  %v369_v18 = vmul.f32 -1.442695, %v244_v14  ;;  %v313_v12 = vstv %s669_s24 }
  0x47   :  { %v375_v46 = vmul.f32 -1.442695, %v281_v15 }
  0x48   :  { %402 = vpow2.f32 %v357_v16 }
  0x49   :  { %404 = vpow2.f32 %v363_v17 }
  0x4a   :  { %406 = vpow2.f32 %v369_v18 }
  0x4b   :  { %408 = vpow2.f32 %v375_v46 }
  0x4e   :  { %v403_v56 = vpop.eup %402 }
  0x4f   :  { %v405_v19 = vpop.eup %404  ;;  %v174_v20 = vadd.f32 1.0, %v403_v56  ;;  %v317_v56 = vstv %s380_s25 }
  0x50   :  { %v407_v21 = vpop.eup %406  ;;  %v211_v22 = vadd.f32 1.0, %v405_v19 }
  0x51   :  { %v409_v23 = vpop.eup %408  ;;  %410 = vrcp.f32 %v174_v20  ;;  %v248_v24 = vadd.f32 1.0, %v407_v21  ;;  %v184_v26 = vand.u32 2147483647, %v174_v20  ;;  %v186_v27 = vand.u32 2147483648, %v174_v20 }
  0x52   :  { %412 = vrcp.f32 %v211_v22  ;;  %v285_v25 = vadd.f32 1.0, %v409_v23  ;;  %v221_v29 = vand.u32 2147483647, %v211_v22  ;;  %v223_v30 = vand.u32 2147483648, %v211_v22 }
  0x53   :  { %414 = vrcp.f32 %v248_v24  ;;  %vm180_vm0 = vweird.f32 %v174_v20  ;;  %vm217_vm1 = vweird.f32 %v211_v22  ;;  %vm659_vm3 = vcmp.eq.f32.partialorder %v184_v26, 8.507059e+37 }
  0x54   :  { %416 = vrcp.f32 %v285_v25  ;;  %v187_v37 = vor.u32 1.1754944e-38, %v186_v27  ;;  %vm663_vm5 = vcmp.eq.f32.partialorder %v221_v29, 8.507059e+37  ;;  %v224_v41 = vor.u32 1.1754944e-38, %v223_v30 }
  0x55   :  { %vm254_vm6 = vweird.f32 %v248_v24  ;;  %v258_v47 = vand.u32 2147483647, %v248_v24  ;;  %v260_v50 = vand.u32 2147483648, %v248_v24  ;;  %vm291_vm8 = vweird.f32 %v285_v25 }
  0x56   :  { %v297_v55 = vand.u32 2147483648, %v285_v25  ;;  %v295_v60 = vand.u32 2147483647, %v285_v25 }
  0x57   :  { %v411_v28 = vpop.eup %410  ;;  %vm685_vm12 = vcmp.eq.f32.partialorder %v258_v47, 8.507059e+37  ;;  %v261_v2 = vor.u32 1.1754944e-38, %v260_v50 }
  0x58   :  { %v413_v31 = vpop.eup %412  ;;  %v176_v32 = vmul.f32 %v411_v28, %v174_v20  ;;  %vm181_vm2 = vweird.f32 %v411_v28  ;;  %v298_v6 = vor.u32 1.1754944e-38, %v297_v55  ;;  %vm296_vm15 = vcmp.eq.f32.partialorder %v295_v60, 8.507059e+37 }
  0x59   :  { %v213_v33 = vmul.f32 %v413_v31, %v211_v22  ;;  %v415_v38 = vpop.eup %414  ;;  %vm218_vm4 = vweird.f32 %v413_v31  ;;  %vm673_vm7 = vmor %vm180_vm0, %vm181_vm2 }
  0x5a   :  { %v177_v35 = vsub.f32 1.0, %v176_v32  ;;  %v417_v42 = vpop.eup %416  ;;  %v250_v45 = vmul.f32 %v415_v38, %v248_v24  ;;  %vm679_vm9 = vmor %vm217_vm1, %vm218_vm4  ;;  %vm255_vm10 = vweird.f32 %v415_v38 }
  0x5b   :  { %v214_v39 = vsub.f32 1.0, %v213_v33  ;;  %v287_v51 = vmul.f32 %v417_v42, %v285_v25  ;;  %vm292_vm11 = vweird.f32 %v417_v42  ;;  %vm695_vm13 = vmor %vm254_vm6, %vm255_vm10 }
  0x5c   :  { %v178_v43 = vmul.f32 %v411_v28, %v177_v35  ;;  %v251_v57 = vsub.f32 1.0, %v250_v45  ;;  %vm293_vm14 = vmor %vm291_vm8, %vm292_vm11 }
  0x5d   :  { %v215_v49 = vmul.f32 %v413_v31, %v214_v39  ;;  %v288_v59 = vsub.f32 1.0, %v287_v51 }
  0x5e   :  { %v179_v53 = vadd.f32 %v411_v28, %v178_v43  ;;  %v252_v62 = vmul.f32 %v415_v38, %v251_v57 }
  0x5f   :  { %v216_v58 = vadd.f32 %v413_v31, %v215_v49  ;;  %v289_v3 = vmul.f32 %v417_v42, %v288_v59 }
  0x60   :  { %v183_v61 = vsel %vm673_vm7, %v411_v28, %v179_v53  ;;  %v253_v5 = vadd.f32 %v415_v38, %v252_v62 }
  0x61   :  { %v188_v0 = vsel %vm659_vm3, %v187_v37, %v183_v61  ;;  %v220_v52 = vsel %vm679_vm9, %v413_v31, %v216_v58  ;;  %v290_v8 = vadd.f32 %v417_v42, %v289_v3 }
  0x62   :  { %v225_v4 = vsel %vm663_vm5, %v224_v41, %v220_v52  ;;  %v303_v7 = vmul.f32 %v302_v34, %v188_v0  ;;  %v257_v11 = vsel %vm695_vm13, %v415_v38, %v253_v5 }
  0x63   :  { %v306_v9 = vmul.f32 %v305_v44, %v225_v4  ;;  %v262_v13 = vsel %vm685_vm12, %v261_v2, %v257_v11  ;;  %v294_v14 = vsel %vm293_vm14, %v417_v42, %v290_v8 }
  0x64   :  { %v299_v16 = vsel %vm296_vm15, %v298_v6, %v294_v14  ;;  %v310_v17 = vmul.f32 %v309_v10, %v262_v13 }
  0x65   :  { %v307_v15 = vadd.f32 %v306_v9, %v303_v7  ;;  %v314_v18 = vmul.f32 %v313_v12, %v299_v16 }
  0x67   :  { %v311_v46 = vadd.f32 %v310_v17, %v307_v15 }
  0x69   :  { %v315_v19 = vadd.f32 %v314_v18, %v311_v46 }
  0x6b   :  { %v318_v20 = vadd.f32 %v317_v56, %v315_v19 }
  0x6d   :  { %319 = vst [vmem:[#allocation7] sm:$0xff] %v318_v20 }
  0x6e   :  { %330 = dma.vmem_to_hbm [thread:$0]  %s326_s26, 128, %s328_s29, [#allocation6]  }
  0x6f   :  { %482 = dma.done.wait [#allocation6], 128  }
  0x70   :  { %483 = vsyncadd [#allocation6], 4294967168 }
  0x71   :  { %335 = vsyncpa [#allocation5], 1 }
  0x72   :  { %336 = vsyncpa [#allocation6], 1 }

</bundles_post_ra>
